<compile_context>
chip_gen: v7x
topology: tpu7x:2x2x1
jax: 0.10.0
libtpu: 0.0.40
codegen_flags: <defaults>
</compile_context>

<pallas_src>
import jax
import jax.numpy as jnp
from jax.experimental import pallas as pl
from jax.experimental.pallas import tpu as pltpu


def _flash_attn_kernel(q_ref, k_ref, v_ref, wo_ref, bo_ref, out_ref,
                       m_scr, l_scr, acc_scr):
    # q_ref:  (1, H, tq, d) bf16  -- pre-scaled query tile (resident over the ki axis)
    # k_ref:  (1, H, tk, d) bf16  -- key tile for this ki step
    # v_ref:  (1, H, tk, d) bf16
    # wo_ref: (H, d, Dq_pad) bf16 -- per-head slab of the output projection (128-lane padded)
    # bo_ref: (1, Dq_pad) f32
    # out_ref:(1, tq, Dq_pad) f32 -- lane-dense output block
    # scratch: m,l (H, tq, 1) f32 ; acc (H, tq, d) f32
    ki = pl.program_id(2)
    nk = pl.num_programs(2)

    @pl.when(ki == 0)
    def _init():
        m_scr[...] = jnp.full_like(m_scr, -jnp.inf)
        l_scr[...] = jnp.zeros_like(l_scr)
        acc_scr[...] = jnp.zeros_like(acc_scr)

    q = q_ref[0]                                   # (H, tq, d) bf16, scale already folded in
    k = k_ref[0]                                   # (H, tk, d) bf16
    v = v_ref[0]                                   # (H, tk, d) bf16

    # Scores for all heads at once (f32 accumulation on the MXU).
    s = jnp.einsum('hqd,hkd->hqk', q, k, preferred_element_type=jnp.float32)

    # Online softmax (elementwise math stays f32).
    m_prev = m_scr[...]
    m_new = jnp.maximum(m_prev, jnp.max(s, axis=-1, keepdims=True))
    alpha = jnp.exp(m_prev - m_new)
    p = jnp.exp(s - m_new)
    l_scr[...] = alpha * l_scr[...] + jnp.sum(p, axis=-1, keepdims=True)
    pv = jnp.einsum('hqk,hkd->hqd', p.astype(jnp.bfloat16), v,
                    preferred_element_type=jnp.float32)            # (H, tq, d)
    acc_scr[...] = alpha * acc_scr[...] + pv
    m_scr[...] = m_new

    @pl.when(ki == nk - 1)
    def _finalize():
        o = acc_scr[...] * pl.reciprocal(l_scr[...], approx=True)  # (H, tq, d) f32
        o = o.astype(jnp.bfloat16)
        # Head-batched lane-dense output projection; summing over heads is equivalent to the
        # reference's `(h d)` concat followed by a single Linear.
        proj = jnp.einsum('hqd,hdf->hqf', o, wo_ref[...],
                          preferred_element_type=jnp.float32)      # (H, tq, Dq_pad)
        out_ref[0] = (jnp.sum(proj, axis=0) + bo_ref[...]).astype(out_ref.dtype)


def _pick_tile(n, target):
    """Largest multiple-of-8 divisor of n that is <= target (or n itself if n <= target)."""
    if n <= target:
        return n
    t = (target // 8) * 8
    while t >= 8:
        if n % t == 0:
            return t
        t -= 8
    return n  # full extent fallback (allowed by BlockSpec); see TODO in the header.


def attention_pallas(x, context, wq, wkv, wo, bo, *, heads, dim_head, tq=None, tk=None):
    if context is None:
        context = x
    B, N, Dq = x.shape
    _, M, Dc = context.shape
    inner = heads * dim_head
    scale = dim_head ** (-0.5)

    # Default tile targets chosen to fit v7x's 64 MiB VMEM; v5e/v6e can pass larger tk.
    tq = _pick_tile(N, 128) if tq is None else tq
    tk = _pick_tile(M, 256) if tk is None else tk
    assert N % tq == 0 and M % tk == 0

    # --- Input projections hoisted out of the kernel: lane-dense XLA matmuls, run once. ---
    q = (x.astype(jnp.float32) @ wq) * scale                       # (B, N, inner), scale folded
    kv = context.astype(jnp.float32) @ wkv                         # (B, M, 2*inner)
    k, v = kv[..., :inner], kv[..., inner:]

    def to_heads(t, s):
        return (t.reshape(B, s, heads, dim_head)
                 .transpose(0, 2, 1, 3)
                 .astype(jnp.bfloat16))                            # (B, H, s, d)

    q_h = to_heads(q, N)
    k_h = to_heads(k, M)
    v_h = to_heads(v, M)

    # --- Output projection: per-head slabs, zero-padded to a 128-lane feature dim. ---
    dq_pad = ((Dq + 127) // 128) * 128
    wo_p = jnp.zeros((inner, dq_pad), jnp.float32).at[:, :Dq].set(wo)
    wo_h = wo_p.reshape(heads, dim_head, dq_pad).astype(jnp.bfloat16)
    bo_p = jnp.zeros((1, dq_pad), jnp.float32).at[:, :Dq].set(bo.reshape(1, Dq))

    out_padded = pl.pallas_call(
        _flash_attn_kernel,
        out_shape=jax.ShapeDtypeStruct((B, N, dq_pad), jnp.float32),
        grid_spec=pltpu.PrefetchScalarGridSpec(
            num_scalar_prefetch=0,
            grid=(B, N // tq, M // tk),
            in_specs=[
                pl.BlockSpec((1, heads, tq, dim_head), lambda b, qi, ki: (b, 0, qi, 0)),  # Q
                pl.BlockSpec((1, heads, tk, dim_head), lambda b, qi, ki: (b, 0, ki, 0)),  # K
                pl.BlockSpec((1, heads, tk, dim_head), lambda b, qi, ki: (b, 0, ki, 0)),  # V
                pl.BlockSpec((heads, dim_head, dq_pad), lambda b, qi, ki: (0, 0, 0)),     # Wo
                pl.BlockSpec((1, dq_pad), lambda b, qi, ki: (0, 0)),                      # bo
            ],
            out_specs=pl.BlockSpec((1, tq, dq_pad), lambda b, qi, ki: (b, qi, 0)),
            scratch_shapes=[
                pltpu.VMEM((heads, tq, 1), jnp.float32),           # running max
                pltpu.VMEM((heads, tq, 1), jnp.float32),           # running denom
                pltpu.VMEM((heads, tq, dim_head), jnp.float32),    # output accumulator
            ],
        ),
        compiler_params=pltpu.CompilerParams(
            dimension_semantics=("parallel", "parallel", "arbitrary"),
            vmem_limit_bytes=48 * 1024 * 1024,  # headroom inside v7x's 64 MiB physical VMEM
        ),
    )(q_h, k_h, v_h, wo_h, bo_p)

    return out_padded[:, :, :Dq]


def attention_ref(x, context, wq, wkv, wo, bo, *, heads, dim_head):
    """Pure-JAX f32 reference mirroring the PyTorch forward exactly."""
    B, N, _ = x.shape
    inner = heads * dim_head
    scale = dim_head ** (-0.5)
    q = x @ wq                                 # (B, N, inner)
    kv = context @ wkv                         # (B, M, 2*inner)
    k, v = kv[..., :inner], kv[..., inner:]

    def split_heads(t):
        b, n, _ = t.shape
        return t.reshape(b, n, heads, dim_head).transpose(0, 2, 1, 3)  # (B, h, n, d)

    qh, kh, vh = map(split_heads, (q, k, v))
    sim = jnp.einsum('bhid,bhjd->bhij', qh, kh) * scale
    attn = jax.nn.softmax(sim, axis=-1)
    o = jnp.einsum('bhij,bhjd->bhid', attn, vh)
    o = o.transpose(0, 2, 1, 3).reshape(B, N, inner)
    return o @ wo + bo


if __name__ == "__main__":
    # Small shapes consistent with the module's (b, n, dim) / (b, m, context_dim) layout.
    B, N, M = 2, 16, 16
    query_dim, context_dim = 32, 48
    heads, dim_head = 4, 16
    inner_dim = heads * dim_head

    key = jax.random.PRNGKey(0)
    kx, kc, kq, kkv, kwo, kbo = jax.random.split(key, 6)

    x = jax.random.normal(kx, (B, N, query_dim), dtype=jnp.float32)
    context = jax.random.normal(kc, (B, M, context_dim), dtype=jnp.float32)

    # Parameters stored as (in, out) so y = x @ W (+ b), matching torch Linear.weight.T.
    wq = jax.random.normal(kq, (query_dim, inner_dim), dtype=jnp.float32) * 0.05
    wkv = jax.random.normal(kkv, (context_dim, 2 * inner_dim), dtype=jnp.float32) * 0.05
    wo = jax.random.normal(kwo, (inner_dim, query_dim), dtype=jnp.float32) * 0.05
    bo = jax.random.normal(kbo, (1, query_dim), dtype=jnp.float32) * 0.05

    # tq/tk chosen so the grid has multiple N tiles and the online softmax runs >1 M step.
    out = attention_pallas(x, context, wq, wkv, wo, bo,
                           heads=heads, dim_head=dim_head, tq=8, tk=8)
    out = jax.block_until_ready(out)

    ref = attention_ref(x, context, wq, wkv, wo, bo, heads=heads, dim_head=dim_head)
    assert out.shape == (B, N, query_dim)
    # bf16 q/k/v/p on the MXU + approx reciprocal => compare against the f32 reference with a
    # bf16-appropriate tolerance (observed errors ~1e-3 at these magnitudes).
    assert jnp.allclose(out, ref, atol=2e-2, rtol=2e-2), "mismatch vs. pure-JAX reference"

    print("KERNEL_OK")
</pallas_src>

<mosaic_0001>
module attributes {stable_mosaic.version = 11 : i64} {
  func.func @_flash_attn_kernel(%arg0: i32, %arg1: i32, %arg2: i32, %arg3: memref<1x4x8x16xbf16, #tpu.memory_space<vmem>>, %arg4: memref<1x4x8x16xbf16, #tpu.memory_space<vmem>>, %arg5: memref<1x4x8x16xbf16, #tpu.memory_space<vmem>>, %arg6: memref<4x16x128xbf16, #tpu.memory_space<vmem>>, %arg7: memref<1x128xf32, #tpu.memory_space<vmem>>, %arg8: memref<1x8x128xf32, #tpu.memory_space<vmem>>, %arg9: memref<4x8x1xf32, #tpu.memory_space<vmem>>, %arg10: memref<4x8x1xf32, #tpu.memory_space<vmem>>, %arg11: memref<4x8x16xf32, #tpu.memory_space<vmem>>) attributes {dimension_semantics = [#tpu.dimension_semantics<parallel>, #tpu.dimension_semantics<parallel>, #tpu.dimension_semantics<arbitrary>], iteration_bounds = array<i64: 2, 2, 2>, scalar_prefetch = 0 : i64, scratch_operands = 3 : i64, tpu.core_type = #tpu.core_type<tc>, window_params = [{transform_indices = @transform_0, window_bounds = array<i64: 1, 4, 8, 16>}, {transform_indices = @transform_1, window_bounds = array<i64: 1, 4, 8, 16>}, {transform_indices = @transform_2, window_bounds = array<i64: 1, 4, 8, 16>}, {pipeline_mode = #tpu.pipeline_mode<synchronous>, transform_indices = @transform_3, window_bounds = array<i64: 4, 16, 128>}, {pipeline_mode = #tpu.pipeline_mode<synchronous>, transform_indices = @transform_4, window_bounds = array<i64: 1, 128>}, {transform_indices = @transform_5, window_bounds = array<i64: 1, 8, 128>}]} {
    %c0_i32 = arith.constant 0 : i32
    %0 = arith.cmpi eq, %arg2, %c0_i32 : i32
    %1 = arith.extui %0 : i1 to i32
    %c0_i32_0 = arith.constant 0 : i32
    %2 = arith.cmpi ne, %1, %c0_i32_0 : i32
    scf.if %2 {
      %cst_34 = arith.constant 0xFF800000 : f32
      %36 = vector.broadcast %cst_34 : f32 to vector<4x8x1xf32>
      %c0_35 = arith.constant 0 : index
      %c0_36 = arith.constant 0 : index
      %c0_37 = arith.constant 0 : index
      %37 = vector.load %arg9[%c0_35, %c0_36, %c0_37] : memref<4x8x1xf32, #tpu.memory_space<vmem>>, vector<4x8x1xf32>
      tpu.vector_store %arg9[%c0_35, %c0_36, %c0_37], %36 {strides = array<i32>} : memref<4x8x1xf32, #tpu.memory_space<vmem>>, vector<4x8x1xf32>,
      %cst_38 = arith.constant 0.000000e+00 : f32
      %38 = vector.broadcast %cst_38 : f32 to vector<4x8x1xf32>
      %c0_39 = arith.constant 0 : index
      %c0_40 = arith.constant 0 : index
      %c0_41 = arith.constant 0 : index
      %39 = vector.load %arg10[%c0_39, %c0_40, %c0_41] : memref<4x8x1xf32, #tpu.memory_space<vmem>>, vector<4x8x1xf32>
      tpu.vector_store %arg10[%c0_39, %c0_40, %c0_41], %38 {strides = array<i32>} : memref<4x8x1xf32, #tpu.memory_space<vmem>>, vector<4x8x1xf32>,
      %cst_42 = arith.constant 0.000000e+00 : f32
      %40 = vector.broadcast %cst_42 : f32 to vector<4x8x16xf32>
      %c0_43 = arith.constant 0 : index
      %c0_44 = arith.constant 0 : index
      %c0_45 = arith.constant 0 : index
      %41 = vector.load %arg11[%c0_43, %c0_44, %c0_45] : memref<4x8x16xf32, #tpu.memory_space<vmem>>, vector<4x8x16xf32>
      tpu.vector_store %arg11[%c0_43, %c0_44, %c0_45], %40 {strides = array<i32>} : memref<4x8x16xf32, #tpu.memory_space<vmem>>, vector<4x8x16xf32>,
    } else {
    }
    %c0 = arith.constant 0 : index
    %c0_1 = arith.constant 0 : index
    %c0_2 = arith.constant 0 : index
    %c0_3 = arith.constant 0 : index
    %3 = vector.load %arg3[%c0, %c0_1, %c0_2, %c0_3] : memref<1x4x8x16xbf16, #tpu.memory_space<vmem>>, vector<1x4x8x16xbf16>
    %4 = vector.shape_cast %3 : vector<1x4x8x16xbf16> to vector<4x8x16xbf16>
    %c0_4 = arith.constant 0 : index
    %c0_5 = arith.constant 0 : index
    %c0_6 = arith.constant 0 : index
    %c0_7 = arith.constant 0 : index
    %5 = vector.load %arg4[%c0_4, %c0_5, %c0_6, %c0_7] : memref<1x4x8x16xbf16, #tpu.memory_space<vmem>>, vector<1x4x8x16xbf16>
    %6 = vector.shape_cast %5 : vector<1x4x8x16xbf16> to vector<4x8x16xbf16>
    %c0_8 = arith.constant 0 : index
    %c0_9 = arith.constant 0 : index
    %c0_10 = arith.constant 0 : index
    %c0_11 = arith.constant 0 : index
    %7 = vector.load %arg5[%c0_8, %c0_9, %c0_10, %c0_11] : memref<1x4x8x16xbf16, #tpu.memory_space<vmem>>, vector<1x4x8x16xbf16>
    %8 = vector.shape_cast %7 : vector<1x4x8x16xbf16> to vector<4x8x16xbf16>
    "tpu.trace_start"() <{level = 10 : i32, message = "hqd,hkd->hqk"}> : () -> ()
    %cst = arith.constant dense<0.000000e+00> : vector<4x8x8xf32>
    %9 = tpu.matmul %4, %6, %cst {dimension_numbers = #tpu.dot_dimension_numbers<[2], [2], [1], [1], [0, 0, 0, 1, 1, 1], [0], [0]>} : vector<4x8x16xbf16>, vector<4x8x16xbf16>, vector<4x8x8xf32> -> vector<4x8x8xf32>
    "tpu.trace_stop"() : () -> ()
    %c0_12 = arith.constant 0 : index
    %c0_13 = arith.constant 0 : index
    %c0_14 = arith.constant 0 : index
    %10 = vector.load %arg9[%c0_12, %c0_13, %c0_14] : memref<4x8x1xf32, #tpu.memory_space<vmem>>, vector<4x8x1xf32>
    %cst_15 = arith.constant dense<0xFF800000> : vector<4x8xf32>
    %11 = vector.multi_reduction <maximumf>, %9, %cst_15 [2] : vector<4x8x8xf32> to vector<4x8xf32>
    %12 = vector.shape_cast %11 : vector<4x8xf32> to vector<4x8x1xf32>
    %13 = arith.maximumf %10, %12 : vector<4x8x1xf32>
    %14 = arith.subf %10, %13 : vector<4x8x1xf32>
    %15 = math.exp %14 : vector<4x8x1xf32>
    %16 = vector.broadcast %13 : vector<4x8x1xf32> to vector<4x8x8xf32>
    %17 = arith.subf %9, %16 : vector<4x8x8xf32>
    %18 = math.exp %17 : vector<4x8x8xf32>
    %c0_16 = arith.constant 0 : index
    %c0_17 = arith.constant 0 : index
    %c0_18 = arith.constant 0 : index
    %19 = vector.load %arg10[%c0_16, %c0_17, %c0_18] : memref<4x8x1xf32, #tpu.memory_space<vmem>>, vector<4x8x1xf32>
    %20 = arith.mulf %15, %19 : vector<4x8x1xf32>
    %cst_19 = arith.constant dense<0.000000e+00> : vector<4x8xf32>
    %21 = vector.multi_reduction <add>, %18, %cst_19 [2] : vector<4x8x8xf32> to vector<4x8xf32>
    %22 = vector.shape_cast %21 : vector<4x8xf32> to vector<4x8x1xf32>
    %23 = arith.addf %20, %22 : vector<4x8x1xf32>
    %c0_20 = arith.constant 0 : index
    %c0_21 = arith.constant 0 : index
    %c0_22 = arith.constant 0 : index
    %24 = vector.load %arg10[%c0_20, %c0_21, %c0_22] : memref<4x8x1xf32, #tpu.memory_space<vmem>>, vector<4x8x1xf32>
    tpu.vector_store %arg10[%c0_20, %c0_21, %c0_22], %23 {strides = array<i32>} : memref<4x8x1xf32, #tpu.memory_space<vmem>>, vector<4x8x1xf32>,
    %25 = arith.truncf %18 : vector<4x8x8xf32> to vector<4x8x8xbf16>
    "tpu.trace_start"() <{level = 10 : i32, message = "hqk,hkd->hqd"}> : () -> ()
    %cst_23 = arith.constant dense<0.000000e+00> : vector<4x8x16xf32>
    %26 = tpu.matmul %25, %8, %cst_23 {dimension_numbers = #tpu.dot_dimension_numbers<[2], [1], [1], [2], [0, 0, 0, 1, 1, 2], [0], [0]>} : vector<4x8x8xbf16>, vector<4x8x16xbf16>, vector<4x8x16xf32> -> vector<4x8x16xf32>
    "tpu.trace_stop"() : () -> ()
    %c0_24 = arith.constant 0 : index
    %c0_25 = arith.constant 0 : index
    %c0_26 = arith.constant 0 : index
    %27 = vector.load %arg11[%c0_24, %c0_25, %c0_26] : memref<4x8x16xf32, #tpu.memory_space<vmem>>, vector<4x8x16xf32>
    %28 = vector.broadcast %15 : vector<4x8x1xf32> to vector<4x8x16xf32>
    %29 = arith.mulf %28, %27 : vector<4x8x16xf32>
    %30 = arith.addf %29, %26 : vector<4x8x16xf32>
    %c0_27 = arith.constant 0 : index
    %c0_28 = arith.constant 0 : index
    %c0_29 = arith.constant 0 : index
    %31 = vector.load %arg11[%c0_27, %c0_28, %c0_29] : memref<4x8x16xf32, #tpu.memory_space<vmem>>, vector<4x8x16xf32>
    tpu.vector_store %arg11[%c0_27, %c0_28, %c0_29], %30 {strides = array<i32>} : memref<4x8x16xf32, #tpu.memory_space<vmem>>, vector<4x8x16xf32>,
    %c0_30 = arith.constant 0 : index
    %c0_31 = arith.constant 0 : index
    %c0_32 = arith.constant 0 : index
    %32 = vector.load %arg9[%c0_30, %c0_31, %c0_32] : memref<4x8x1xf32, #tpu.memory_space<vmem>>, vector<4x8x1xf32>
    tpu.vector_store %arg9[%c0_30, %c0_31, %c0_32], %13 {strides = array<i32>} : memref<4x8x1xf32, #tpu.memory_space<vmem>>, vector<4x8x1xf32>,
    %c1_i32 = arith.constant 1 : i32
    %33 = arith.cmpi eq, %arg2, %c1_i32 : i32
    %34 = arith.extui %33 : i1 to i32
    %c0_i32_33 = arith.constant 0 : i32
    %35 = arith.cmpi ne, %34, %c0_i32_33 : i32
    scf.if %35 {
      %c0_34 = arith.constant 0 : index
      %c0_35 = arith.constant 0 : index
      %c0_36 = arith.constant 0 : index
      %36 = vector.load %arg11[%c0_34, %c0_35, %c0_36] : memref<4x8x16xf32, #tpu.memory_space<vmem>>, vector<4x8x16xf32>
      %c0_37 = arith.constant 0 : index
      %c0_38 = arith.constant 0 : index
      %c0_39 = arith.constant 0 : index
      %37 = vector.load %arg10[%c0_37, %c0_38, %c0_39] : memref<4x8x1xf32, #tpu.memory_space<vmem>>, vector<4x8x1xf32>
      %38 = tpu.reciprocal %37 {approx = true} : vector<4x8x1xf32> -> vector<4x8x1xf32>
      %39 = vector.broadcast %38 : vector<4x8x1xf32> to vector<4x8x16xf32>
      %40 = arith.mulf %36, %39 : vector<4x8x16xf32>
      %41 = arith.truncf %40 : vector<4x8x16xf32> to vector<4x8x16xbf16>
      %c0_40 = arith.constant 0 : index
      %c0_41 = arith.constant 0 : index
      %c0_42 = arith.constant 0 : index
      %42 = vector.load %arg6[%c0_40, %c0_41, %c0_42] : memref<4x16x128xbf16, #tpu.memory_space<vmem>>, vector<4x16x128xbf16>
      "tpu.trace_start"() <{level = 10 : i32, message = "hqd,hdf->hqf"}> : () -> ()
      %cst_43 = arith.constant dense<0.000000e+00> : vector<4x8x128xf32>
      %43 = tpu.matmul %41, %42, %cst_43 {dimension_numbers = #tpu.dot_dimension_numbers<[2], [1], [1], [2], [0, 0, 0, 1, 1, 2], [0], [0]>} : vector<4x8x16xbf16>, vector<4x16x128xbf16>, vector<4x8x128xf32> -> vector<4x8x128xf32>
      "tpu.trace_stop"() : () -> ()
      %cst_44 = arith.constant dense<0.000000e+00> : vector<8x128xf32>
      %44 = vector.multi_reduction <add>, %43, %cst_44 [0] : vector<4x8x128xf32> to vector<8x128xf32>
      %c0_45 = arith.constant 0 : index
      %c0_46 = arith.constant 0 : index
      %45 = vector.load %arg7[%c0_45, %c0_46] : memref<1x128xf32, #tpu.memory_space<vmem>>, vector<1x128xf32>
      %46 = vector.broadcast %45 : vector<1x128xf32> to vector<8x128xf32>
      %47 = arith.addf %44, %46 : vector<8x128xf32>
      %c0_47 = arith.constant 0 : index
      %c0_48 = arith.constant 0 : index
      %c0_49 = arith.constant 0 : index
      %48 = vector.load %arg8[%c0_47, %c0_48, %c0_49] : memref<1x8x128xf32, #tpu.memory_space<vmem>>, vector<1x8x128xf32>
      %49 = vector.shape_cast %48 : vector<1x8x128xf32> to vector<8x128xf32>
      %50 = vector.shape_cast %47 : vector<8x128xf32> to vector<1x8x128xf32>
      tpu.vector_store %arg8[%c0_47, %c0_48, %c0_49], %50 {strides = array<i32>} : memref<1x8x128xf32, #tpu.memory_space<vmem>>, vector<1x8x128xf32>,
    } else {
    }
    return
  }
  func.func @transform_0(%arg0: i32, %arg1: i32, %arg2: i32) -> (i32, i32, i32, i32) {
    %c0_i32 = arith.constant 0 : i32
    %c0_i32_0 = arith.constant 0 : i32
    %c0_i32_1 = arith.constant 0 : i32
    return %arg0, %c0_i32, %arg1, %c0_i32_0 : i32, i32, i32, i32
  }
  func.func @transform_1(%arg0: i32, %arg1: i32, %arg2: i32) -> (i32, i32, i32, i32) {
    %c0_i32 = arith.constant 0 : i32
    %c0_i32_0 = arith.constant 0 : i32
    %c0_i32_1 = arith.constant 0 : i32
    return %arg0, %c0_i32, %arg2, %c0_i32_0 : i32, i32, i32, i32
  }
  func.func @transform_2(%arg0: i32, %arg1: i32, %arg2: i32) -> (i32, i32, i32, i32) {
    %c0_i32 = arith.constant 0 : i32
    %c0_i32_0 = arith.constant 0 : i32
    %c0_i32_1 = arith.constant 0 : i32
    return %arg0, %c0_i32, %arg2, %c0_i32_0 : i32, i32, i32, i32
  }
  func.func @transform_3(%arg0: i32, %arg1: i32, %arg2: i32) -> (i32, i32, i32) {
    %c0_i32 = arith.constant 0 : i32
    %c0_i32_0 = arith.constant 0 : i32
    %c0_i32_1 = arith.constant 0 : i32
    %c0_i32_2 = arith.constant 0 : i32
    return %c0_i32, %c0_i32_0, %c0_i32_1 : i32, i32, i32
  }
  func.func @transform_4(%arg0: i32, %arg1: i32, %arg2: i32) -> (i32, i32) {
    %c0_i32 = arith.constant 0 : i32
    %c0_i32_0 = arith.constant 0 : i32
    %c0_i32_1 = arith.constant 0 : i32
    return %c0_i32, %c0_i32_0 : i32, i32
  }
  func.func @transform_5(%arg0: i32, %arg1: i32, %arg2: i32) -> (i32, i32, i32) {
    %c0_i32 = arith.constant 0 : i32
    %c0_i32_0 = arith.constant 0 : i32
    return %arg0, %arg1, %c0_i32 : i32, i32, i32
  }
}

</mosaic_0001>

<bundles_post_ra>
// kernel: tpu_custom_call.1
= control target key start
LH: loop header
LB: loop body
LE: loop exit
PB: predicated region body
PF: predicated region fallthrough
CT: control target
= control target key end

     0   :  { %s2522_s0 = inlined_call_operand.hbm [shape: bf16[2,4,16,16], index: 0, kind: input, shape index: {}]   ;;  %s2523_s1 = inlined_call_operand.hbm [shape: bf16[2,4,16,16], index: 1, kind: input, shape index: {}]   ;;  %s2524_s2 = inlined_call_operand.hbm [shape: bf16[2,4,16,16], index: 2, kind: input, shape index: {}]   ;;  %s2525_s3 = inlined_call_operand.hbm [shape: bf16[4,16,128], index: 3, kind: input, shape index: {}]   ;;  %s2526_s4 = inlined_call_operand.vmem [shape: f32[1,128], index: 4, kind: input, shape index: {}]   ;;  %s2527_s5 = inlined_call_operand.hbm [shape: f32[2,16,128], index: 5, kind: output, shape index: {}]  }
   0x1   :  { %2559 = sst [smem:[#allocation31_spill]] %s2523_s1 }
   0x2   :  { %2560 = sst [smem:[#allocation32_spill]] %s2525_s3 }
   0x3   :  { %2561 = sst [smem:[#allocation33_spill]] %s2526_s4 }
   0x4   :  { %2562 = sst [smem:[#allocation34_spill]] %s2527_s5 }
   0x5   :  { %10 = vsyncpa [#allocation6], 0 }
   0x6   :  { %12 = vsyncpa [#allocation6 + $0x1], 0 }
   0x7   :  { %13 = vsyncpa [#allocation9], 0 }
   0x8   :  { %15 = vsyncpa [#allocation9 + $0x1], 0 }
   0x9   :  { %16 = vsyncpa [#allocation12], 0 }
   0xa   :  { %17 = vsyncpa [#allocation7], 0 }
   0xb   :  { %19 = vsyncpa [#allocation7 + $0x1], 0  ;;  %s1962_s18 = smov 0   ;;  %s1964_s19 = smov 0  }
   0xc   :  { %s1966_s20 = smov 0   ;;  %s1968_s21 = smov 0  }
   0xd   :  { %s1970_s22 = smov 0   ;;  %s1972_s23 = smov 0  }
   0xe   :  { %s1974_s24 = smov 0   ;;  %s1976_s25 = smov 0  }
   0xf   :  { %s1978_s26 = smov 0   ;;  %s1980_s27 = smov 0  }
  0x10   :  { %s1982_s28 = smov 0   ;;  %s1984_s29 = smov 0  }
  0x11   :  { %s1986_s30 = smov 0  }
  0x12 LB: > { %2563 = sst [smem:[#allocation18_spill]] %s1870_s19  ;;  %s37_s6 = sadd.s32 1, %s1902_s27  ;;  %s1914_s30 = sphi %s1986_s30, %s25_s30   ;;  %s1910_s29 = sphi %s1984_s29, %s2637_s29   ;;  %s1906_s28 = sphi %s1982_s28, %s2627_s28   ;;  %s1902_s27 = sphi %s1980_s27, %s2636_s27   ;;  %s1898_s26 = sphi %s1978_s26, %s2635_s26   ;;  %s1894_s25 = sphi %s1976_s25, %s2626_s25   ;;  %s1890_s24 = sphi %s1974_s24, %s2634_s24   ;;  %s1886_s23 = sphi %s1972_s23, %s2633_s23   ;;  %s1882_s22 = sphi %s1970_s22, %s2632_s22   ;;  %s1878_s21 = sphi %s1968_s21, %s2631_s21   ;;  %s1874_s20 = sphi %s1966_s20, %s2630_s20   ;;  %s1870_s19 = sphi %s1964_s19, %s2629_s19   ;;  %s1866_s18 = sphi %s1962_s18, %s2624_s18  }
  0x13   : > { %2564 = sst [smem:[#allocation19_spill]] %s1878_s21  ;;  %p2029_p0 = scmp.ge.s32.totalorder %s37_s6, 2 }
  0x14   : > { %2565 = sst [smem:[#allocation20_spill]] %s1882_s22  ;;  %p2531_p1 = scmp.eq.s32.totalorder %s1914_s30, 0 }
  0x15   : > { %2566 = sst [smem:[#allocation21_spill]] %s1890_s24  ;;  %p88_p2 = scmp.ne.s32.totalorder %s1874_s20, %s1870_s19 }
  0x16   : > { %2567 = sst [smem:[#allocation22_spill]] %s1894_s25  ;;  %s2639_s6 = smov (%p2029_p0, %s37_s6), 0 }
  0x17   : > { %2568 = sst [smem:[#allocation23_spill]] %s1898_s26  ;;  %p2043_p3 = por %p88_p2, %p2531_p1 }
  0x18   : > { %2569 = sst [smem:[#allocation24_spill]] %s1906_s28  ;;  %p2530_p4 = scmp.lt.s32.totalorder %s1914_s30, 8 }
  0x19   : > { %s2529_s12 = sshll.u32 %s1910_s29, 3  ;;  %s254_s13 = sand.u32 1, %s1914_s30  }
  0x1a   : > { %s256_s14 = sand.u32 1, %s1874_s20   ;;  %s263_s16 = sadd.s32 %s1902_s27, %s2529_s12 }
  0x1b   : > { %s1336_s15 = sshll.u32 %s256_s14, 4  ;;  %s1338_s17 = sshll.u32 %s263_s16, 6 }
  0x1c   : > { %s258_s9 = scalar_lea.vmem [#allocation8], %s1336_s15  ;;  %s2572_s1 = sld [smem:[#allocation31_spill]] }
  0x1d   : > { %s266_s7 = sshll.u32 %s258_s9, 4  ;;  %p2067_p5 = pnand %p2530_p4, %p2043_p3  ;;  %s2061_s7 = int_to_ptr.vmem [resolvable:$true] %s266_s7 }
  0x1e   : > { %s2074_s5 = scalar_lea.hbm %s2524_s2, %s1338_s17  ;;  %s280_s25 = scalar_lea.vmem [#allocation10], %s1336_s15 }
  0x1f   : > { %s2573_s14 = scalar_select %p2067_p5, 1, 0 }
  0x20   : > { %s288_s9 = sshll.u32 %s280_s25, 4  ;;  %s2078_s12 = scalar_lea.sflag [#allocation9], %s254_s13  ;;  %s2076_s9 = int_to_ptr.vmem [resolvable:$true] %s288_s9 }
  0x21   : > { %p2532_p7 = pneg %p2067_p5 }
  0x22   : > { %s2059_s26 = scalar_lea.hbm %s2572_s1, %s1338_s17  ;;  %s1655_s16 = scalar_lea.hbm %s2572_s1, 1024 }
  0x23   : > { %s1650_s10 = scalar_lea.hbm %s2059_s26, 256  ;;  %p1656_p10 = scmp.lt.u32.totalorder %s2059_s26, %s2572_s1 }
  0x24   : > { %p1651_p6 = scmp.ne.s32.totalorder %s2059_s26, %s1650_s10  ;;  %p1657_p11 = scmp.lt.u32.totalorder %s1655_s16, %s1650_s10 }
  0x25   : > { %p1659_p13 = scmp.lt.u32.totalorder %s1650_s10, %s2059_s26 }
  0x26   : > { %p1653_p8 = pnand %p2532_p7, %p1651_p6  ;;  %p1658_p12 = por %p1657_p11, %p1656_p10 }
  0x28   : > { %p1654_p9 = pneg %p1653_p8  ;;  %p1660_p2 = por %p1659_p13, %p1658_p12 }
  0x2a   : > { %p1661_p3 = pnand %p1660_p2, %p1654_p9 }
  0x2c   : > { %1664 = shalt.err (!%p1661_p3)
}
  0x2d   : > { %s1665_s13 = scalar_lea.vmem %s2061_s7, 256  ;;  %s1916_s4 = smov [#allocation8]  }
  0x2e   : > { %p1666_p6 = scmp.ne.s32.totalorder %s2061_s7, %s1665_s13  ;;  %s1670_s15 = sshll.u32 %s1916_s4, 4  ;;  %s1671_s15 = int_to_ptr.vmem [resolvable:$false] %s1670_s15 }
  0x2f   : > { %s1672_s24 = scalar_lea.vmem %s1671_s15, 512  ;;  %p1673_p1 = scmp.lt.s32.totalorder %s2061_s7, %s1671_s15 }
  0x30   : > { %p1668_p8 = pnand %p1666_p6, %p2532_p7  ;;  %p1674_p10 = scmp.lt.s32.totalorder %s1672_s24, %s1665_s13 }
  0x32   : > { %p1669_p4 = pneg %p1668_p8  ;;  %p1675_p11 = por %p1674_p10, %p1673_p1 }
  0x34   : > { %p1676_p12 = pnand %p1675_p11, %p1669_p4 }
  0x36   : > { %1679 = shalt.err (!%p1676_p12)
}
  0x37   : > { %s2533_s25 = smov 128   ;;  %s2535_s10 = smov 64  }
  0x38   : > { %s2537_s11 = smov 4   ;;  %s2110_s16 = sadd.s32 4294967295, %s1914_s30  }
  0x39   : > { %1490 = dma.hbm_to_vmem [thread:$0]  (!%p2067_p5), %s2059_s26, 256, %s2061_s7, %s2078_s12, %s2533_s25, %s2535_s10, %s2537_s11  }
  0x3a   : > { %2574 = sst [smem:[#allocation25_spill]] %s2110_s16  ;;  %s1329_s17 = sadd.s32 4294967294, %s1914_s30  }
  0x3b   : > { %p66_p1 = scmp.ne.s32.totalorder %s1882_s22, %s1878_s21  ;;  %p2543_p4 = scmp.eq.s32.totalorder %s2110_s16, 0 }
  0x3c   : > { %p94_p9 = scmp.ne.s32.totalorder %s1870_s19, %s1866_s18  ;;  %p196_p3 = scmp.eq.s32.totalorder %s1329_s17, 7 }
  0x3d   : > { %p2121_p2 = por %p2543_p4, %p66_p1  ;;  %p1330_p8 = scmp.ge.s32.totalorder %s1914_s30, 1 }
  0x3e   : > { %p2127_p6 = por %p94_p9, %p2543_p4  ;;  %p2132_p10 = por %p196_p3, %p66_p1 }
  0x3f   : > { %s2575_s13 = scalar_select %p2121_p2, 1, 0 }
  0x40   : > { %s2577_s26 = scalar_select %p2127_p6, 1, 0 }
  0x41   : > { %2576 = sst [smem:[#allocation26_spill]] %s2575_s13  ;;  %p203_p11 = scmp.lt.s32.totalorder %s1914_s30, 9 }
  0x42   : > { %2578 = sst [smem:[#allocation27_spill]] %s2577_s26  ;;  %s1920_s4 = smov [#allocation11]  }
  0x43   : > { %s2579_s7 = scalar_select %p2132_p10, 1, 0 }
  0x44   : > { %p2137_p12 = pnand %p1330_p8, %p203_p11  ;;  %s215_s15 = sshll.u32 %s1920_s4, 4  ;;  %s216_s15 = int_to_ptr.vmem [resolvable:$true] %s215_s15 }
  0x45   : > { %2580 = sst [smem:[#allocation28_spill]] %s2579_s7  ;;  %s40_s17 = sadd.s32 1, %s1906_s28 }
  0x46   : > { %s2581_s18 = scalar_select %p2137_p12, 1, 0 }
  0x47   : > { %p1480_p7 = pneg %p2137_p12  ;;  %s2641_s17 = smov (!%p2029_p0, %s40_s17), %s1906_s28 }
  0x48   : > { %s2583_s3 = sld [smem:[#allocation32_spill]] }
  0x49   : > { %p2145_p9 = pnand %p1480_p7, %p2543_p4 }
  0x4b   : > { %p1682_p3 = pneg %p2145_p9 }
  0x4e   : > { %s1680_s1 = scalar_lea.hbm %s2583_s3, 512 }
  0x4f   : > { %p1681_p1 = scmp.ne.s32.totalorder %s2583_s3, %s1680_s1  ;;  %p1687_p11 = scmp.lt.u32.totalorder %s1680_s1, %s2583_s3 }
  0x51   : > { %p1683_p8 = pnand %p1682_p3, %p1681_p1 }
  0x53   : > { %p1684_p7 = pneg %p1683_p8 }
  0x55   : > { %p1689_p4 = pnand %p1687_p11, %p1684_p7 }
  0x57   : > { %1692 = shalt.err (!%p1689_p4)
}
  0x58   : > { %s1693_s8 = scalar_lea.vmem %s216_s15, 512  ;;  %p1701_p6 = scmp.lt.s32.totalorder %s216_s15, %s216_s15 }
  0x59   : > { %p1694_p0 = scmp.ne.s32.totalorder %s216_s15, %s1693_s8  ;;  %p1702_p2 = scmp.lt.s32.totalorder %s1693_s8, %s1693_s8 }
  0x5b   : > { %p1696_p13 = pnand %p1694_p0, %p1682_p3  ;;  %p1703_p12 = por %p1702_p2, %p1701_p6 }
  0x5d   : > { %p1697_p10 = pneg %p1696_p13 }
  0x5f   : > { %p1704_p5 = pnand %p1703_p12, %p1697_p10 }
  0x61   : > { %1707 = shalt.err (!%p1704_p5)
}
  0x62   : > { %s2584_s21 = smov 4   ;;  %s2585_s10 = smov 64  }
  0x63   : > { %1483 = dma.hbm_to_vmem [thread:$0]  (!%p2145_p9), %s2583_s3, 512, %s216_s15, [#allocation12], %s2585_s10, %s2585_s10, %s2584_s21  }
  0x64   : > { %p42_p5 = scmp.ge.s32.totalorder %s2641_s17, 2  ;;  %p60_p4 = scmp.ne.s32.totalorder %s1886_s23, %s1882_s22 }
  0x65   : > { %s232_s1 = sand.u32 1, %s1886_s23   ;;  %s2586_s26 = sshll.u32 %s1910_s29, 3 }
  0x66   : > { %s241_s24 = sadd.s32 %s1906_s28, %s2586_s26  ;;  %s2643_s17 = smov (%p42_p5, %s2641_s17), 0 }
  0x67   : > { %2587 = sst [smem:[#allocation29_spill]] %s2643_s17  ;;  %s2588_s4 = sadd.s32 1, %s1910_s29 }
  0x68   : > { %s2645_s4 = smov (!%p42_p5, %s2588_s4), %s1910_s29  ;;  %s49_s8 = ssub.s32 %s1906_s28, %s2643_s17 }
  0x69   : > { %p2589_p13 = scmp.eq.s32.totalorder %s1914_s30, 0  ;;  %p46_p6 = scmp.ge.s32.totalorder %s2645_s4, 2 }
  0x6a   : > { %p2591_p10 = scmp.eq.s32.totalorder %s2110_s16, 7  ;;  %s1333_s7 = sshll.u32 %s232_s1, 4 }
  0x6b   : > { %p2188_p2 = por %p2589_p13, %p60_p4  ;;  %s2647_s4 = smov (%p46_p6, %s2645_s4), 0 }
  0x6c   : > { %p2194_p12 = por %p2591_p10, %p60_p4  ;;  %s1335_s26 = sshll.u32 %s241_s24, 6 }
  0x6d   : > { %s48_s25 = ssub.s32 %s1910_s29, %s2647_s4  ;;  %s2205_s28 = scalar_lea.hbm %s2522_s0, %s1335_s26 }
  0x6e   : > { %s2592_s15 = scalar_select %p2194_p12, 1, 0 }
  0x6f   : > { %s50_s19 = sor.u32 %s49_s8, %s48_s25  ;;  %s2594_s13 = ssub.s32 %s1902_s27, %s2639_s6 }
  0x70   : > { %2593 = sst [smem:[#allocation30_spill]] %s2592_s15  ;;  %s78_s16 = sor.u32 %s2594_s13, %s48_s25 }
  0x71   : > { %p51_p9 = scmp.eq.s32.totalorder %s50_s19, 0  ;;  %p79_p1 = scmp.eq.s32.totalorder %s78_s16, 0 }
  0x72   : > { %s236_s15 = scalar_lea.vmem [#allocation5], %s1333_s7  ;;  %p2595_p3 = scmp.lt.s32.totalorder %s1914_s30, 8 }
  0x73   : > { %s244_s22 = sshll.u32 %s236_s15, 4  ;;  %s2597_s3 = sadd.s32 1, %s1886_s23  ;;  %s2228_s22 = int_to_ptr.vmem [resolvable:$true] %s244_s22 }
  0x74   : > { %p2214_p8 = pnand %p2595_p3, %p2188_p2  ;;  %s2598_s8 = sadd.s32 1, %s1874_s20 }
  0x75   : > { %s2221_s17 = scalar_select %p51_p9, %s1886_s23, %s2597_s3  }
  0x76   : > { %s2226_s26 = scalar_select %p79_p1, %s1874_s20, %s2598_s8  }
  0x77   : > { %s2230_s19 = scalar_lea.sflag [#allocation6], %s232_s1  ;;  %s1708_s25 = scalar_lea.hbm %s2205_s28, 256 }
  0x78   : > { %p1709_p7 = scmp.ne.s32.totalorder %s2205_s28, %s1708_s25  ;;  %p1710_p11 = pneg %p2214_p8 }
  0x79   : > { %s1713_s11 = scalar_lea.hbm %s2522_s0, 1024  ;;  %p1714_p4 = scmp.lt.u32.totalorder %s2205_s28, %s2522_s0 }
  0x7a   : > { %p1711_p0 = pnand %p1710_p11, %p1709_p7  ;;  %p1715_p13 = scmp.lt.u32.totalorder %s1713_s11, %s1708_s25 }
  0x7b   : > { %p1717_p6 = scmp.lt.u32.totalorder %s1708_s25, %s2205_s28 }
  0x7c   : > { %p1712_p5 = pneg %p1711_p0  ;;  %p1716_p2 = por %p1715_p13, %p1714_p4 }
  0x7e   : > { %p1718_p10 = por %p1717_p6, %p1716_p2 }
  0x80   : > { %p1719_p9 = pnand %p1718_p10, %p1712_p5 }
  0x82   : > { %1722 = shalt.err (!%p1719_p9)
}
  0x83   : > { %s1723_s1 = scalar_lea.vmem %s2228_s22, 256  ;;  %s1921_s3 = smov [#allocation5]  }
  0x84   : > { %p1724_p1 = scmp.ne.s32.totalorder %s2228_s22, %s1723_s1  ;;  %s1728_s8 = sshll.u32 %s1921_s3, 4  ;;  %s1729_s8 = int_to_ptr.vmem [resolvable:$false] %s1728_s8 }
  0x85   : > { %s1730_s16 = scalar_lea.vmem %s1729_s8, 512  ;;  %p1731_p0 = scmp.lt.s32.totalorder %s2228_s22, %s1729_s8 }
  0x86   : > { %p1726_p3 = pnand %p1724_p1, %p1710_p11  ;;  %p1732_p4 = scmp.lt.s32.totalorder %s1730_s16, %s1723_s1 }
  0x88   : > { %p1727_p7 = pneg %p1726_p3  ;;  %p1733_p13 = por %p1732_p4, %p1731_p0 }
  0x8a   : > { %p1734_p2 = pnand %p1733_p13, %p1727_p7 }
  0x8c   : > { %1737 = shalt.err (!%p1734_p2)
}
  0x8d   : > { %s2599_s25 = smov 128   ;;  %s1738_s13 = scalar_lea.hbm %s2074_s5, 256 }
  0x8e   : > { %1487 = dma.hbm_to_vmem [thread:$0]  (!%p2214_p8), %s2205_s28, 256, %s2228_s22, %s2230_s19, %s2599_s25, %s2585_s10, %s2584_s21  }
  0x8f   : > { %p1739_p11 = scmp.ne.s32.totalorder %s2074_s5, %s1738_s13  ;;  %p2600_p5 = scmp.ne.s32.totalorder %s2573_s14, 0 }
  0x90   : > { %s1743_s15 = scalar_lea.hbm %s2524_s2, 1024  ;;  %p1744_p1 = scmp.lt.u32.totalorder %s2074_s5, %s2524_s2 }
  0x91   : > { %p2601_p6 = pneg %p2600_p5  ;;  %p1745_p3 = scmp.lt.u32.totalorder %s1743_s15, %s1738_s13 }
  0x92   : > { %p1747_p0 = scmp.lt.u32.totalorder %s1738_s13, %s2074_s5 }
  0x93   : > { %p1741_p10 = pnand %p1739_p11, %p2601_p6  ;;  %p1746_p7 = por %p1745_p3, %p1744_p1 }
  0x95   : > { %p1742_p9 = pneg %p1741_p10  ;;  %p1748_p4 = por %p1747_p0, %p1746_p7 }
  0x97   : > { %p1749_p13 = pnand %p1748_p4, %p1742_p9 }
  0x99   : > { %1752 = shalt.err (!%p1749_p13)
}
  0x9a   : > { %s1753_s22 = scalar_lea.vmem %s2076_s9, 256  ;;  %p2602_p2 = pmov %p2601_p6 }
  0x9b   : > { %p1754_p8 = scmp.ne.s32.totalorder %s2076_s9, %s1753_s22  ;;  %s1922_s28 = smov [#allocation10]  }
  0x9c   : > { %s1758_s19 = sshll.u32 %s1922_s28, 4  ;;  %s1759_s19 = int_to_ptr.vmem [resolvable:$false] %s1758_s19 }
  0x9d   : > { %p1756_p11 = pnand %p1754_p8, %p2602_p2  ;;  %s1760_s3 = scalar_lea.vmem %s1759_s19, 512 }
  0x9e   : > { %p1761_p10 = scmp.lt.s32.totalorder %s2076_s9, %s1759_s19  ;;  %p1762_p1 = scmp.lt.s32.totalorder %s1760_s3, %s1753_s22 }
  0x9f   : > { %p1757_p6 = pneg %p1756_p11 }
  0xa0   : > { %p1763_p3 = por %p1762_p1, %p1761_p10 }
  0xa2   : > { %p1764_p7 = pnand %p1763_p3, %p1757_p6 }
  0xa4   : > { %1767 = shalt.err (!%p1764_p7)
}
  0xa5   : > { %1493 = dma.hbm_to_vmem [thread:$0]  (!%p2600_p5), %s2074_s5, 256, %s2076_s9, %s2078_s12, %s2599_s25, %s2585_s10, %s2584_s21  }
  0xa6   : > { %p2603_p9 = scmp.ne.s32.totalorder %s2581_s18, 0 }
  0xa7   : > { %s2604_s8 = sld [smem:[#allocation20_spill]] (!%p2603_p9) }
  0xa8   : > { %300 = sbr.rel (%p2603_p9) target bundleno = 1318 (0x526), region = 40  ;;  %s2605_s16 = sld [smem:[#allocation26_spill]] (!%p2603_p9) }
  0xad   : > { %s2291_s13 = sand.u32 (!%p2603_p9), 1, %s2604_s8  }
  0xae   : > { %s1343_s11 = sshll.u32 (!%p2603_p9), %s2291_s13, 4  ;;  %s303_s24 = scalar_lea.sflag (!%p2603_p9), [#allocation6], %s2291_s13 }
  0xaf   : > { %s2295_s15 = scalar_lea.vmem [#allocation5], %s1343_s11  ;;  %p2606_p0 = scmp.ne.s32.totalorder %s2605_s16, 0 }
  0xb1   : > { %1849 = dma.done.wait (%p2606_p0), %s303_s24, 256  }
  0xb2   : > { %1851 = vsyncadd (%p2606_p0), %s303_s24, 4294967040  ;;  %s2607_s14 = sld [smem:[#allocation25_spill]]  ;;  %s2609_s5 = sld [smem:[#allocation27_spill]] }
  0xb3   : > { %s2608_s12 = sld [smem:[#allocation18_spill]] }
  0xb8   : > { %s311_s9 = sand.u32 1, %s2607_s14   ;;  %p2610_p5 = scmp.ne.s32.totalorder %s2609_s5, 0 }
  0xb9   : > { %s313_s18 = sand.u32 1, %s2608_s12   ;;  %s312_s10 = scalar_lea.sflag [#allocation9], %s311_s9 }
  0xba   : > { %s1344_s21 = sshll.u32 %s313_s18, 4 }
  0xbb   : > { %s2303_s25 = scalar_lea.vmem [#allocation8], %s1344_s21 }
  0xbc   : > { %1853 = dma.done.wait (%p2610_p5), %s312_s10, 512  }
  0xbd   : > { %1855 = vsyncadd (%p2610_p5), %s312_s10, 4294966784  ;;  %s2309_s7 = scalar_lea.vmem [#allocation10], %s1344_s21  ;;  %p2611_p4 = scmp.eq.s32.totalorder %s2607_s14, 0 }
  0xbf   : > { %1857 = dma.done.wait (%p2611_p4), [#allocation12], 512   ;;  %p2612_p13 = pmov %p2611_p4 }
  0xc0   : > { %s1347_s1 = sshll.u32 %s2291_s13, 3  ;;  %s2613_s28 = sld [smem:[#allocation21_spill]] }
  0xc1   : > { %1859 = vsyncadd (%p2612_p13), [#allocation12], 4294966784  ;;  %s2316_s22 = scalar_lea.vmem [#allocation13], %s1347_s1 }
  0xc6   : > { %p1348_p8 = scmp.ne.s32.totalorder %s2613_s28, 0 }
  0xc7   : > { %vm370_vm0 = vcmask (!%p1348_p8), 7168   ;;  %vm379_vm1 = vcmask (!%p1348_p8), 130048   ;;  %v1923_v0 = vmov (!%p1348_p8), -inf   ;;  %v1924_v1 = vmov (!%p1348_p8), 0.0  }
  0xc8   : > { %369 = sbr.rel (%p1348_p8) target bundleno = 207 (0xcf), region = 60  ;;  %371 = vst.msk [vmem:[#allocation2] sm:$0xff] (!%p1348_p8), %vm370_vm0, %v1923_v0  ;;  %372 = vst.msk [vmem:[#allocation2 + $0x8] sm:$0xff] (!%p1348_p8), %vm370_vm0, %v1923_v0 }
  0xc9   : > { %373 = vst.msk [vmem:[#allocation2 + $0x10] sm:$0xff] (!%p1348_p8), %vm370_vm0, %v1923_v0  ;;  %374 = vst.msk [vmem:[#allocation2 + $0x18] sm:$0xff] (!%p1348_p8), %vm370_vm0, %v1923_v0 }
  0xca   : > { %375 = vst.msk [vmem:[#allocation3] sm:$0xff] (!%p1348_p8), %vm370_vm0, %v1924_v1  ;;  %376 = vst.msk [vmem:[#allocation3 + $0x8] sm:$0xff] (!%p1348_p8), %vm370_vm0, %v1924_v1 }
  0xcb   : > { %377 = vst.msk [vmem:[#allocation3 + $0x10] sm:$0xff] (!%p1348_p8), %vm370_vm0, %v1924_v1  ;;  %378 = vst.msk [vmem:[#allocation3 + $0x18] sm:$0xff] (!%p1348_p8), %vm370_vm0, %v1924_v1 }
  0xcc   : > { %380 = vst.msk [vmem:[#allocation4] sm:$0xff] (!%p1348_p8), %vm379_vm1, %v1924_v1  ;;  %381 = vst.msk [vmem:[#allocation4 + $0x8] sm:$0xff] (!%p1348_p8), %vm379_vm1, %v1924_v1 }
  0xcd   : > { %382 = vst.msk [vmem:[#allocation4 + $0x10] sm:$0xff] (!%p1348_p8), %vm379_vm1, %v1924_v1  ;;  %383 = vst.msk [vmem:[#allocation4 + $0x18] sm:$0xff] (!%p1348_p8), %vm379_vm1, %v1924_v1 }
  0xcf PF: > { %v388_v2 = vld [vmem:[%s2303_s25] sm:$0xf]  ;;  %vm396_vm2 = vcmask 130048   ;;  %v389_v3 = vld [vmem:[%s2303_s25 + $0x4] sm:$0xf]  ;;  %v1925_v4 = vmov 0.0  }
  0xd0   : > { %1396 = vmatprep.subr.bf16.mxu0 %v1925_v4  ;;  %v401_v5 = vsel %vm396_vm2, %v388_v2, 0  ;;  %1402 = vmatprep.subr.bf16.mxu1 %v1925_v4  ;;  %v447_v6 = vsel %vm396_vm2, %v389_v3, 0  ;;  %vm1926_vm3 = vmmov 0   ;;  %v390_v7 = vld [vmem:[%s2303_s25 + $0x8] sm:$0xf]  ;;  %vm585_vm4 = vcmask 64512  }
  0xd1   : > { %1397 = vmatpush3.bf16.xpose.msra.mxu0 %v401_v5  ;;  %1403 = vmatpush3.bf16.xpose.msra.mxu1 %v447_v6  ;;  %v391_v8 = vld [vmem:[%s2303_s25 + $0xc] sm:$0xf]  ;;  %v384_v9 = vld [vmem:[%s2295_s15] sm:$0xf]  ;;  %v385_v10 = vld [vmem:[%s2295_s15 + $0x4] sm:$0xf] }
  0xd2   : > { %1398 = vmatprep.mubr.msk.bf16.mxu0 %vm1926_vm3, %v1925_v4  ;;  %1408 = vmatprep.subr.bf16.mxu0 %v1925_v4  ;;  %v493_v11 = vsel %vm396_vm2, %v390_v7, 0  ;;  %v539_v12 = vsel %vm396_vm2, %v391_v8, 0  ;;  %v386_v13 = vld [vmem:[%s2295_s15 + $0x8] sm:$0xf]  ;;  %v387_v14 = vld [vmem:[%s2295_s15 + $0xc] sm:$0xf] }
  0xd3   : > { %1404 = vmatprep.mubr.msk.bf16.mxu1 %vm1926_vm3, %v1925_v4  ;;  %1414 = vmatprep.subr.bf16.mxu1 %v1925_v4  ;;  %v1927_v35 = vmov 0   ;;  %v581_v36 = vld [vmem:[#allocation2] sm:$0xff]  ;;  %vm670_vm5 = vcmask 7168   ;;  %v2369_v39 = vld [vmem:[#allocation2 + $0x8] sm:$0xff]  ;;  %v583_v44 = vld [vmem:[#allocation2 + $0x10] sm:$0xff]  ;;  %vm682_vm6 = vcmask 1043456  }
  0xd4   : > { %1618 = vset.pattern.permute.xlu0 %v1927_v35  ;;  %1619 = vset.pattern.permute.xlu1 %v1927_v35  ;;  %v2380_v48 = vld [vmem:[#allocation2 + $0x18] sm:$0xff]  ;;  %v392_v53 = vld [vmem:[%s2309_s7] sm:$0xf]  ;;  %v393_v56 = vld [vmem:[%s2309_s7 + $0x4] sm:$0xf]  ;;  %s2614_s19 = sld [smem:[#allocation21_spill]] }
  0xd5   : > { %v684_v54 = vsel %vm682_vm6, %v392_v53, 0  ;;  %v730_v57 = vsel %vm682_vm6, %v393_v56, 0  ;;  %v394_v6 = vld [vmem:[%s2309_s7 + $0x8] sm:$0xf]  ;;  %v866_v56 = vld [vmem:[#allocation4 + $0x10] sm:$0xff] }
  0xd8   : > { %1399 = vmatmul.mubr.msk.bf16.vlgmr.msra.gmra.mrb[0].mxu0 %vm396_vm2, %v384_v9  ;;  %1405 = vmatmul.mubr.msk.bf16.vlgmr.msra.gmra.mrb[0].mxu1 %vm396_vm2, %v385_v10 }
  0xd9   : > { %1409 = vmatpush3.bf16.xpose.msra.mxu0 %v493_v11  ;;  %1415 = vmatpush3.bf16.xpose.msra.mxu1 %v539_v12  ;;  %v776_v11 = vsel %vm682_vm6, %v394_v6, 0  ;;  %v395_v12 = vld [vmem:[%s2309_s7 + $0xc] sm:$0xf] }
  0xda   : > { %1410 = vmatprep.mubr.msk.bf16.mxu0 %vm1926_vm3, %v1925_v4  ;;  %1416 = vmatprep.mubr.msk.bf16.mxu1 %vm1926_vm3, %v1925_v4  ;;  %p1357_p2 = scmp.ne.s32.totalorder %s2614_s19, 1 }
  0xdb   : > { %1420 = vmatprep.subr.bf16.mxu0 %v1925_v4  ;;  %1426 = vmatprep.subr.bf16.mxu1 %v1925_v4  ;;  %vm1930_vm7 = vmmov (!%p1357_p2), 0   ;;  %s2615_s16 = sld [smem:[#allocation33_spill]] (!%p1357_p2) }
  0xe0   : > { %1411 = vmatmul.mubr.msk.bf16.vlgmr.msra.gmra.mrb[4].mxu0 %vm396_vm2, %v386_v13  ;;  %1417 = vmatmul.mubr.msk.bf16.vlgmr.msra.gmra.mrb[4].mxu1 %vm396_vm2, %v387_v14 }
  0xe1   : > { %1422 = vmatprep.mubr.msk.bf16.mxu0 %vm1926_vm3, %v1925_v4  ;;  %1428 = vmatprep.mubr.msk.bf16.mxu1 %vm1926_vm3, %v1925_v4 }
  0xe2   : > { %1421 = vmatpush3.bf16.msra.mxu0 %v684_v54  ;;  %1427 = vmatpush3.bf16.msra.mxu1 %v730_v57 }
  0xe3   : > { %1432 = vmatprep.subr.bf16.mxu0 %v1925_v4  ;;  %1438 = vmatprep.subr.bf16.mxu1 %v1925_v4 }
 0x1ab   : > { %v2353_v15 = vpop.f32.mrb[0].mxu0  ;;  %v2355_v16 = vpop.f32.mrb[0].mxu1 }
 0x1ac   : > { %v1400_v17 = vpop.f32.mrb[1].mxu0  ;;  %v586_v18 = vsel %vm585_vm4, %v2353_v15, -inf  ;;  %v1406_v19 = vpop.f32.mrb[1].mxu1  ;;  %v589_v24 = vsel %vm585_vm4, %v2355_v16, -inf }
 0x1ad   : > { %587 = vmax.xlane.f32.xlu0 %v586_v18  ;;  %v440_v20 = vpop.f32.mrb[2].mxu0  ;;  %v486_v21 = vpop.f32.mrb[2].mxu1  ;;  %v822_v17 = vsel %vm682_vm6, %v395_v12, 0 }
 0x1ae   : > { %v1401_v22 = vpop.f32.mrb[3].mxu0  ;;  %v1407_v23 = vpop.f32.mrb[3].mxu1 }
 0x1b1   : > { %590 = vmax.xlane.f32.xlu0 %v589_v24 }
 0x1b3   : > { %v2361_v25 = vpop.f32.mrb[4].mxu0  ;;  %v2363_v26 = vpop.f32.mrb[4].mxu1 }
 0x1b4   : > { %v1412_v27 = vpop.f32.mrb[5].mxu0  ;;  %v592_v28 = vsel %vm585_vm4, %v2361_v25, -inf  ;;  %v1418_v29 = vpop.f32.mrb[5].mxu1  ;;  %v595_v34 = vsel %vm585_vm4, %v2363_v26, -inf }
 0x1b5   : > { %593 = vmax.xlane.f32.xlu1 %v592_v28  ;;  %v532_v30 = vpop.f32.mrb[6].mxu0  ;;  %v578_v31 = vpop.f32.mrb[6].mxu1  ;;  %v646_v29 = vld [vmem:[#allocation3] sm:$0xff] }
 0x1b6   : > { %v1413_v32 = vpop.f32.mrb[7].mxu0  ;;  %v1419_v33 = vpop.f32.mrb[7].mxu1 }
 0x1b7   : > { %v647_v32 = vld [vmem:[#allocation3 + $0x8] sm:$0xff] }
 0x1b9   : > { %596 = vmax.xlane.f32.xlu1 %v595_v34 }
 0x23a   : > { %v588_v37 = vpop.xlane.xlu0 %587 }
 0x23b   : > { %v598_v38 = vmax.f32 %v581_v36, %v588_v37 }
 0x23d   : > { %v602_v40 = vsub.f32 %v581_v36, %v598_v38  ;;  %900 = vst.msk [vmem:[#allocation2] sm:$0xff] %vm670_vm5, %v598_v38  ;;  %616 = vperm.xlu0 %1618, %v598_v38   ;;  %v648_v38 = vld [vmem:[#allocation3 + $0x10] sm:$0xff] }
 0x23e   : > { %v591_v41 = vpop.xlane.xlu0 %590 }
 0x23f   : > { %v606_v42 = vmul.f32 1.442695, %v602_v40  ;;  %v2373_v43 = vmax.f32 %v2369_v39, %v591_v41  ;;  %v649_v41 = vld [vmem:[#allocation3 + $0x18] sm:$0xff] }
 0x241   : > { %1620 = vpow2.f32 %v606_v42  ;;  %v603_v45 = vsub.f32 %v2369_v39, %v2373_v43  ;;  %901 = vst.msk [vmem:[#allocation2 + $0x8] sm:$0xff] %vm670_vm5, %v2373_v43  ;;  %621 = vperm.xlu1 %1619, %v2373_v43  }
 0x242   : > { %v594_v46 = vpop.xlane.xlu1 %593 }
 0x243   : > { %v600_v47 = vmax.f32 %v583_v44, %v594_v46  ;;  %v608_v21 = vmul.f32 1.442695, %v603_v45  ;;  %v864_v46 = vld [vmem:[#allocation4] sm:$0xff] }
 0x245   : > { %v604_v49 = vsub.f32 %v583_v44, %v600_v47  ;;  %902 = vst.msk [vmem:[#allocation2 + $0x10] sm:$0xff] %vm670_vm5, %v600_v47  ;;  %626 = vperm.xlu1 %1619, %v600_v47  }
 0x246   : > { %v597_v50 = vpop.xlane.xlu1 %596 }
 0x247   : > { %v2384_v51 = vmax.f32 %v2380_v48, %v597_v50  ;;  %v610_v14 = vmul.f32 1.442695, %v604_v49 }
 0x249   : > { %v605_v52 = vsub.f32 %v2380_v48, %v2384_v51  ;;  %903 = vst.msk [vmem:[#allocation2 + $0x18] sm:$0xff] %vm670_vm5, %v2384_v51  ;;  %631 = vperm.xlu1 %1619, %v2384_v51   ;;  %v865_v48 = vld [vmem:[#allocation4 + $0x8] sm:$0xff] }
 0x24b   : > { %v2393_v55 = vpop.eup %1620 }
 0x24c   : > { %v650_v30 = vmul.f32 %v2393_v55, %v646_v29 }
 0x24d   : > { %870 = vperm.xlu1 %1619, %v2393_v55  }
 0x2bc   : > { %v617_v58 = vpop.permute.xlu0 %616 }
 0x2bd   : > { %v634_v59 = vsub.f32 %v2353_v15, %v617_v58 }
 0x2bf   : > { %v638_v60 = vmul.f32 1.442695, %v634_v59 }
 0x2c0   : > { %v622_v61 = vpop.permute.xlu1 %621 }
 0x2c1   : > { %1622 = vpow2.f32 %v638_v60  ;;  %v635_v62 = vsub.f32 %v2355_v16, %v622_v61 }
 0x2c3   : > { %v640_v63 = vmul.f32 1.442695, %v635_v62 }
 0x2c4   : > { %v627_v0 = vpop.permute.xlu1 %626 }
 0x2c5   : > { %1624 = vpow2.f32 %v640_v63  ;;  %v636_v1 = vsub.f32 %v2361_v25, %v627_v0  ;;  %v867_v63 = vld [vmem:[#allocation4 + $0x18] sm:$0xff] }
 0x2c7   : > { %v642_v2 = vmul.f32 1.442695, %v636_v1 }
 0x2c8   : > { %v632_v3 = vpop.permute.xlu1 %631 }
 0x2c9   : > { %1626 = vpow2.f32 %v642_v2  ;;  %v637_v5 = vsub.f32 %v2363_v26, %v632_v3  ;;  %v612_v26 = vmul.f32 1.442695, %v605_v52 }
 0x2cb   : > { %v1623_v7 = vpop.eup %1622  ;;  %v644_v8 = vmul.f32 1.442695, %v637_v5 }
 0x2cc   : > { %v654_v9 = vsel %vm585_vm4, %v1623_v7, 0.0  ;;  %v675_v10 = vpack.c.bf16 %v1623_v7, %v1623_v7  ;;  %v871_v28 = vpop.permute.xlu1 %870 }
 0x2cd   : > { %1628 = vpow2.f32 %v644_v8  ;;  %655 = vadd.xlane.f32.xlu1 %v654_v9  ;;  %v888_v47 = vmul.f32 %v871_v28, %v864_v46 }
 0x2ce   : > { %1423 = vmatmul.mubr.msk.bf16.vlgmr.msra.gmra.mrb[8].mxu0 %vm585_vm4, %v675_v10  ;;  %1630 = vpow2.f32 %v610_v14 }
 0x2cf   : > { %v1625_v13 = vpop.eup %1624  ;;  %1433 = vmatpush3.bf16.msra.mxu0 %v776_v11  ;;  %1434 = vmatprep.mubr.msk.bf16.mxu0 %vm1926_vm3, %v1925_v4  ;;  %1632 = vpow2.f32 %v608_v21  ;;  %v1929_v21 = vmov (!%p1357_p2), 0.0  }
 0x2d0   : > { %v657_v15 = vsel %vm585_vm4, %v1625_v13, 0.0  ;;  %v676_v16 = vpack.c.bf16 %v1625_v13, %v1625_v13  ;;  %1634 = vpow2.f32 %v612_v26  ;;  %1444 = vmatprep.subr.bf16.mxu0 (!%p1357_p2), %v1929_v21 }
 0x2d1   : > { %658 = vadd.xlane.f32.xlu0 %v657_v15 }
 0x2d2   : > { %1429 = vmatmul.mubr.msk.bf16.vlgmr.msra.gmra.mrb[8].mxu1 %vm585_vm4, %v676_v16  ;;  %v1928_v16 = vmov (!%p1357_p2), 0  }
 0x2d3   : > { %v1627_v18 = vpop.eup %1626  ;;  %1439 = vmatpush3.bf16.msra.mxu1 %v822_v17  ;;  %1440 = vmatprep.mubr.msk.bf16.mxu1 %vm1926_vm3, %v1925_v4 }
 0x2d4   : > { %v677_v19 = vpack.c.bf16 %v1627_v18, %v1627_v18  ;;  %v660_v25 = vsel %vm585_vm4, %v1627_v18, 0.0  ;;  %1450 = vmatprep.subr.bf16.mxu1 (!%p1357_p2), %v1929_v21 }
 0x2d6   : > { %1435 = vmatmul.mubr.msk.bf16.vlgmr.msra.gmra.mrb[12].mxu0 %vm585_vm4, %v677_v19  ;;  %v1638_v19 = vld [vmem:[#allocation11] sm:$0xff] (!%p1357_p2)  }
 0x2d7   : > { %v1629_v20 = vpop.eup %1628  ;;  %1445 = vmatpush3.bf16.msra.mxu0 (!%p1357_p2), %v1638_v19  ;;  %1446 = vmatprep.mubr.msk.bf16.mxu0 (!%p1357_p2), %vm1930_vm7, %v1929_v21 }
 0x2d8   : > { %v678_v22 = vpack.c.bf16 %v1629_v20, %v1629_v20  ;;  %v1631_v23 = vpop.eup %1630  ;;  %v663_v4 = vsel %vm585_vm4, %v1629_v20, 0.0  ;;  %1456 = vmatprep.subr.bf16.mxu0 (!%p1357_p2), %v1929_v21 }
 0x2d9   : > { %v1633_v24 = vpop.eup %1632  ;;  %v652_v39 = vmul.f32 %v1631_v23, %v648_v38 }
 0x2da   : > { %1441 = vmatmul.mubr.msk.bf16.vlgmr.msra.gmra.mrb[12].mxu1 %vm585_vm4, %v678_v22  ;;  %v1635_v27 = vpop.eup %1634  ;;  %v651_v34 = vmul.f32 %v1633_v24, %v647_v32 }
 0x2db   : > { %v653_v43 = vmul.f32 %v1635_v27, %v649_v41  ;;  %1452 = vmatprep.mubr.msk.bf16.mxu1 (!%p1357_p2), %vm1930_vm7, %v1929_v21 }
 0x2de   : > { %880 = vperm.xlu1 %1619, %v1631_v23  }
 0x2e7   : > { %875 = vperm.xlu0 %1618, %v1633_v24   ;;  %v1639_v24 = vld [vmem:[#allocation11 + $0x8] sm:$0xff] (!%p1357_p2)  }
 0x2e8   : > { %1451 = vmatpush3.bf16.msra.mxu1 (!%p1357_p2), %v1639_v24 }
 0x2e9   : > { %1462 = vmatprep.subr.bf16.mxu1 (!%p1357_p2), %v1929_v21 }
 0x2eb   : > { %1636 = vset.pattern.permute.xlu0 (!%p1357_p2), %v1928_v16 }
 0x302   : > { %661 = vadd.xlane.f32.xlu1 %v660_v25 }
 0x306   : > { %664 = vadd.xlane.f32.xlu1 %v663_v4 }
 0x317   : > { %885 = vperm.xlu1 %1619, %v1635_v27  }
 0x31b   : > { %1637 = vset.pattern.permute.xlu1 (!%p1357_p2), %v1928_v16 }
 0x35a   : > { %v656_v31 = vpop.xlane.xlu1 %655 }
 0x35b   : > { %v666_v33 = vadd.f32 %v656_v31, %v650_v30  ;;  %v1640_v30 = vld [vmem:[#allocation11 + $0x10] sm:$0xff] (!%p1357_p2)  }
 0x35d   : > { %671 = vst.msk [vmem:[#allocation3] sm:$0xff] %vm670_vm5, %v666_v33 }
 0x35e   : > { %v659_v35 = vpop.xlane.xlu0 %658  ;;  %v881_v37 = vpop.permute.xlu1 %880 }
 0x35f   : > { %v667_v36 = vadd.f32 %v659_v35, %v651_v34  ;;  %v890_v61 = vmul.f32 %v881_v37, %v866_v56  ;;  %v1641_v35 = vld [vmem:[#allocation11 + $0x18] sm:$0xff] (!%p1357_p2)  }
 0x361   : > { %672 = vst.msk [vmem:[#allocation3 + $0x8] sm:$0xff] %vm670_vm5, %v667_v36 }
 0x364   : > { %v912_v13 = vld [vmem:[#allocation3] sm:$0xff] (!%p1357_p2) }
 0x365   : > { %1642 = vrcp.f32 (!%p1357_p2), %v912_v13 }
 0x366   : > { %v876_v49 = vpop.permute.xlu0 %875 }
 0x367   : > { %v889_v54 = vmul.f32 %v876_v49, %v865_v48 }
 0x368   : > { %v913_v15 = vld [vmem:[#allocation3 + $0x8] sm:$0xff] (!%p1357_p2) }
 0x36f   : > { %v1643_v18 = vpop.eup (!%p1357_p2), %1642 }
 0x370   : > { %922 = vperm.xlu0 (!%p1357_p2), %1636, %v1643_v18  }
 0x38f   : > { %v662_v40 = vpop.xlane.xlu1 %661 }
 0x390   : > { %v668_v42 = vadd.f32 %v662_v40, %v652_v39 }
 0x392   : > { %673 = vst.msk [vmem:[#allocation3 + $0x10] sm:$0xff] %vm670_vm5, %v668_v42 }
 0x393   : > { %v665_v44 = vpop.xlane.xlu1 %664 }
 0x394   : > { %v669_v45 = vadd.f32 %v665_v44, %v653_v43 }
 0x396   : > { %674 = vst.msk [vmem:[#allocation3 + $0x18] sm:$0xff] %vm670_vm5, %v669_v45 }
 0x397   : > { %v886_v0 = vpop.permute.xlu1 %885 }
 0x398   : > { %v891_v6 = vmul.f32 %v886_v0, %v867_v63 }
 0x399   : > { %v914_v14 = vld [vmem:[#allocation3 + $0x10] sm:$0xff] (!%p1357_p2) }
 0x39a   : > { %1644 = vrcp.f32 (!%p1357_p2), %v914_v14 }
 0x39b   : > { %1646 = vrcp.f32 (!%p1357_p2), %v913_v15 }
 0x39d   : > { %v915_v17 = vld [vmem:[#allocation3 + $0x18] sm:$0xff] (!%p1357_p2) }
 0x39e   : > { %1648 = vrcp.f32 (!%p1357_p2), %v915_v17 }
 0x3a1   : > { %v720_v50 = vpop.f32.mrb[8].mxu0 }
 0x3a2   : > { %v892_v51 = vadd.f32 %v888_v47, %v720_v50  ;;  %v1424_v52 = vpop.f32.mrb[9].mxu0 }
 0x3a3   : > { %v723_v53 = vpop.f32.mrb[10].mxu0 }
 0x3a4   : > { %896 = vst.msk [vmem:[#allocation4] sm:$0xff] %vm396_vm2, %v892_v51  ;;  %v1425_v55 = vpop.f32.mrb[11].mxu0  ;;  %v1645_v20 = vpop.eup (!%p1357_p2), %1644 }
 0x3a5   : > { %v766_v57 = vpop.f32.mrb[8].mxu1  ;;  %v1647_v22 = vpop.eup (!%p1357_p2), %1646  ;;  %932 = vperm.xlu1 (!%p1357_p2), %1637, %v1645_v20  }
 0x3a6   : > { %v893_v58 = vadd.f32 %v889_v54, %v766_v57  ;;  %v1430_v59 = vpop.f32.mrb[9].mxu1  ;;  %927 = vperm.xlu0 (!%p1357_p2), %1636, %v1647_v22   ;;  %v1366_v57 = vld [vmem:[%s2615_s16] ss:$0 sm:$0xff] (!%p1357_p2) }
 0x3a7   : > { %v769_v60 = vpop.f32.mrb[10].mxu1 }
 0x3a8   : > { %897 = vst.msk [vmem:[#allocation4 + $0x8] sm:$0xff] %vm396_vm2, %v893_v58  ;;  %v1431_v62 = vpop.f32.mrb[11].mxu1  ;;  %v1649_v23 = vpop.eup (!%p1357_p2), %1648 }
 0x3a9   : > { %v812_v1 = vpop.f32.mrb[12].mxu0  ;;  %937 = vperm.xlu1 (!%p1357_p2), %1637, %v1649_v23  }
 0x3aa   : > { %v894_v2 = vadd.f32 %v890_v61, %v812_v1  ;;  %v1436_v3 = vpop.f32.mrb[13].mxu0  ;;  %907 = sbr.rel (%p1357_p2) target bundleno = 1291 (0x50b), region = 64 }
 0x3ab   : > { %v815_v5 = vpop.f32.mrb[14].mxu0  ;;  %v908_v25 = vld [vmem:[#allocation4] sm:$0xff] (!%p1357_p2) }
 0x3ac   : > { %898 = vst.msk [vmem:[#allocation4 + $0x10] sm:$0xff] %vm396_vm2, %v894_v2  ;;  %v1437_v7 = vpop.f32.mrb[15].mxu0 }
 0x3ad   : > { %v858_v8 = vpop.f32.mrb[12].mxu1 }
 0x3ae   : > { %v895_v9 = vadd.f32 %v891_v6, %v858_v8  ;;  %v1442_v10 = vpop.f32.mrb[13].mxu1 }
 0x3af   : > { %v861_v11 = vpop.f32.mrb[14].mxu1  ;;  %v909_v29 = vld [vmem:[#allocation4 + $0x8] sm:$0xff] (!%p1357_p2) }
 0x3b0   : > { %899 = vst.msk [vmem:[#allocation4 + $0x18] sm:$0xff] %vm396_vm2, %v895_v9  ;;  %v1443_v12 = vpop.f32.mrb[15].mxu1 }
 0x3b3   : > { %v910_v28 = vld [vmem:[#allocation4 + $0x10] sm:$0xff] }
 0x3b7   : > { %v911_v38 = vld [vmem:[#allocation4 + $0x18] sm:$0xff] }
 0x3ef   : > { %v923_v4 = vpop.permute.xlu0 %922 }
 0x3f0   : > { %v940_v26 = vmul.f32 %v923_v4, %v908_v25 }
 0x3f2   : > { %v944_v31 = vpack.c.bf16 %v940_v26, %v940_v26 }
 0x3f4   : > { %1447 = vmatmul.mubr.msk.bf16.vlgmr.msra.gmra.mrb[0].mxu0 %vm396_vm2, %v944_v31 }
 0x3f5   : > { %1457 = vmatpush3.bf16.msra.mxu0 %v1640_v30  ;;  %1458 = vmatprep.mubr.msk.bf16.mxu0 %vm1930_vm7, %v1929_v21 }
 0x424   : > { %v933_v27 = vpop.permute.xlu1 %932 }
 0x425   : > { %v928_v32 = vpop.permute.xlu0 %927  ;;  %v942_v33 = vmul.f32 %v933_v27, %v910_v28 }
 0x426   : > { %v941_v34 = vmul.f32 %v928_v32, %v909_v29 }
 0x427   : > { %v946_v39 = vpack.c.bf16 %v942_v33, %v942_v33 }
 0x428   : > { %v945_v36 = vpack.c.bf16 %v941_v34, %v941_v34  ;;  %v938_v37 = vpop.permute.xlu1 %937 }
 0x429   : > { %v943_v40 = vmul.f32 %v938_v37, %v911_v38  ;;  %1459 = vmatmul.mubr.msk.bf16.vlgmr.msra.gmra.mrb[4].mxu0 %vm396_vm2, %v946_v39 }
 0x42a   : > { %1453 = vmatmul.mubr.msk.bf16.vlgmr.msra.gmra.mrb[0].mxu1 %vm396_vm2, %v945_v36 }
 0x42b   : > { %1463 = vmatpush3.bf16.msra.mxu1 %v1641_v35  ;;  %1464 = vmatprep.mubr.msk.bf16.mxu1 %vm1930_vm7, %v1929_v21  ;;  %v947_v41 = vpack.c.bf16 %v943_v40, %v943_v40 }
 0x432   : > { %1465 = vmatmul.mubr.msk.bf16.vlgmr.msra.gmra.mrb[4].mxu1 %vm396_vm2, %v947_v41 }
 0x4c7   : > { %v999_v42 = vpop.f32.mrb[0].mxu0 }
 0x4c8   : > { %v1448_v43 = vpop.f32.mrb[1].mxu0 }
 0x4c9   : > { %v1002_v44 = vpop.f32.mrb[2].mxu0 }
 0x4ca   : > { %v1449_v45 = vpop.f32.mrb[3].mxu0 }
 0x4fc   : > { %v1097_v51 = vpop.f32.mrb[4].mxu0 }
 0x4fd   : > { %v1048_v46 = vpop.f32.mrb[0].mxu1  ;;  %v1460_v53 = vpop.f32.mrb[5].mxu0 }
 0x4fe   : > { %v1152_v47 = vadd.f32 %v1048_v46, %v999_v42  ;;  %v1454_v48 = vpop.f32.mrb[1].mxu1  ;;  %v1100_v54 = vpop.f32.mrb[6].mxu0 }
 0x4ff   : > { %v1051_v49 = vpop.f32.mrb[2].mxu1  ;;  %v1461_v55 = vpop.f32.mrb[7].mxu0 }
 0x500   : > { %v1455_v50 = vpop.f32.mrb[3].mxu1  ;;  %v1153_v52 = vadd.f32 %v1152_v47, %v1097_v51 }
 0x505   : > { %v1146_v56 = vpop.f32.mrb[4].mxu1 }
 0x506   : > { %v1154_v58 = vadd.f32 %v1153_v52, %v1146_v56  ;;  %v1466_v59 = vpop.f32.mrb[5].mxu1 }
 0x507   : > { %v1149_v60 = vpop.f32.mrb[6].mxu1 }
 0x508   : > { %v1162_v61 = vadd.f32 %v1366_v57, %v1154_v58  ;;  %v1467_v62 = vpop.f32.mrb[7].mxu1 }
 0x50a   : > { %1163 = vst [vmem:[%s2316_s22] sm:$0xff] %v1162_v61 }
 0x50b PF: > { %s2616_s11 = sld [smem:[#allocation23_spill]]  ;;  %s2617_s24 = sld [smem:[#allocation22_spill]] }
 0x50c   : > { %s1180_s5 = sshll.u32 %s2316_s22, 4  ;;  %s2619_s10 = sld [smem:[#allocation34_spill]]  ;;  %s2451_s5 = int_to_ptr.vmem [resolvable:$true] %s1180_s5 }
 0x50d   : > { %s1165_s7 = scalar_lea.sflag [#allocation7], %s2291_s13  ;;  %s1768_s1 = scalar_lea.vmem %s2451_s5, 128 }
 0x50e   : > { %p1769_p11 = scmp.ne.s32.totalorder %s2451_s5, %s1768_s1  ;;  %s1931_s28 = smov [#allocation13]  }
 0x50f   : > { %s1772_s19 = sshll.u32 %s1931_s28, 4  ;;  %s1773_s19 = int_to_ptr.vmem [resolvable:$false] %s1772_s19 }
 0x510   : > { %p1770_p6 = pnand %p1769_p11, %p2194_p12  ;;  %s1774_s22 = scalar_lea.vmem %s1773_s19, 256 }
 0x511   : > { %s1368_s14 = sshll.u32 %s2616_s11, 1  ;;  %p1775_p1 = scmp.lt.s32.totalorder %s2451_s5, %s1773_s19 }
 0x512   : > { %s1176_s12 = sadd.s32 %s2617_s24, %s1368_s14  ;;  %p1771_p10 = pneg %p1770_p6 }
 0x513   : > { %s1369_s9 = sshll.u32 %s1176_s12, 7  ;;  %p1776_p3 = scmp.lt.s32.totalorder %s1774_s22, %s1768_s1 }
 0x514   : > { %s1178_s25 = scalar_lea.hbm %s2619_s10, %s1369_s9 }
 0x515   : > { %p1777_p7 = por %p1776_p3, %p1775_p1 }
 0x517   : > { %p1778_p9 = pnand %p1777_p7, %p1771_p10 }
 0x519   : > { %1781 = shalt.err (!%p1778_p9)
}
 0x51a   : > { %s1782_s3 = scalar_lea.hbm %s1178_s25, 128  ;;  %s1786_s16 = scalar_lea.hbm %s2619_s10, 512 }
 0x51b   : > { %p1783_p0 = scmp.ne.s32.totalorder %s1178_s25, %s1782_s3  ;;  %p1787_p13 = scmp.lt.u32.totalorder %s1178_s25, %s2619_s10 }
 0x51c   : > { %p1788_p8 = scmp.lt.u32.totalorder %s1786_s16, %s1782_s3  ;;  %p1790_p11 = scmp.lt.u32.totalorder %s1782_s3, %s1178_s25 }
 0x51d   : > { %p1784_p5 = pnand %p1783_p0, %p2194_p12 }
 0x51e   : > { %p1789_p2 = por %p1788_p8, %p1787_p13 }
 0x51f   : > { %p1785_p4 = pneg %p1784_p5 }
 0x520   : > { %p1791_p6 = por %p1790_p11, %p1789_p2 }
 0x522   : > { %p1792_p10 = pnand %p1791_p6, %p1785_p4 }
 0x524   : > { %1795 = shalt.err (!%p1792_p10)
}
 0x525   : > { %1478 = dma.vmem_to_hbm [thread:$0]  (%p2194_p12), %s2451_s5, 128, %s1178_s25, %s1165_s7  }
 0x526 PF: > { %s2620_s14 = sld [smem:[#allocation19_spill]]  ;;  %s2621_s12 = sld [smem:[#allocation28_spill]] }
 0x527   : > { %p1501_p1 = scmp.ge.s32.totalorder %s1914_s30, 2 }
 0x52c   : > { %s1192_s9 = sand.u32 1, %s2620_s14   ;;  %p2622_p3 = scmp.ne.s32.totalorder %s2621_s12, 0 }
 0x52d   : > { %s1193_s18 = scalar_lea.sflag [#allocation7], %s1192_s9 }
 0x52e   : > { %p1495_p7 = pnand %p1501_p1, %p2622_p3 }
 0x530   : > { %1861 = dma.done.wait (!%p1495_p7), %s1193_s18, 128  }
 0x531   : > { %1863 = vsyncadd (!%p1495_p7), %s1193_s18, 4294967168  ;;  %s25_s30 = sadd.s32 1, %s1914_s30   ;;  %s2624_s18 = sld [smem:[#allocation18_spill]] }
 0x532   : > { %p2478_p9 = scmp.ge.s32.totalorder %s25_s30, 10   ;;  %s2625_s15 = sld [smem:[#allocation20_spill]] }
 0x533   : > { %s2626_s25 = sld [smem:[#allocation24_spill]]  ;;  %s2627_s28 = sld [smem:[#allocation29_spill]] }
 0x534   : > { %s2629_s19 = smov %s1874_s20  ;;  %s2630_s20 = smov %s2226_s26 }
 0x535   : > { %s2632_s22 = smov %s1886_s23  ;;  %s2633_s23 = smov %s2221_s17 }
 0x536   : > { %s2634_s24 = smov %s1902_s27  ;;  %s2635_s26 = smov %s1910_s29 }
 0x537   : > { %s2636_s27 = smov %s2639_s6  ;;  %s2637_s29 = smov %s2647_s4 }
 0x538   : > { %s2631_s21 = smov %s2625_s15  ;;  %24 = sbr.rel (!%p2478_p9) target bundleno = 18 (0x12), region = 121 }
 0x53f   :  { %1198 = vsyncpa [#allocation6], 1 }
 0x540   :  { %1200 = vsyncpa [#allocation6 + $0x1], 1 }
 0x541   :  { %1201 = vsyncpa [#allocation9], 1 }
 0x542   :  { %1203 = vsyncpa [#allocation9 + $0x1], 1 }
 0x543   :  { %1204 = vsyncpa [#allocation12], 1 }
 0x544   :  { %1205 = vsyncpa [#allocation7], 1 }
 0x545   :  { %1207 = vsyncpa [#allocation7 + $0x1], 1 }

</bundles_post_ra>
